<compile_context>
chip_gen: v6e
topology: v6e:2x2x1
jax: 0.10.0
libtpu: 0.0.40
codegen_flags: <defaults>
</compile_context>

<pallas_src>
import functools

import jax
import jax.numpy as jnp
from jax.experimental import pallas as pl
from jax.experimental.pallas import tpu as pltpu


def _ce_lse_kernel(logits_ref, lse_ref, m_ref, l_ref, *, c_total, tc):
    """Streaming row-wise logsumexp; class blocks on grid axis 1 (reduction)."""
    k = pl.program_id(1)
    nk = pl.num_programs(1)

    @pl.when(k == 0)
    def _():
        m_ref[...] = jnp.full(m_ref.shape, -jnp.inf, dtype=jnp.float32)
        l_ref[...] = jnp.zeros(l_ref.shape, dtype=jnp.float32)

    # Stream the native-dtype tile; compute in f32 (safe on v5e).
    x = logits_ref[...].astype(jnp.float32)                     # (tn, tc)

    def update(xm):
        m_old = m_ref[...]
        m_new = jnp.maximum(m_old, jnp.max(xm, axis=-1, keepdims=True))
        # exp(-inf - m_new) == 0, so masked lanes vanish without a select.
        l_ref[...] = (jnp.exp(m_old - m_new) * l_ref[...]
                      + jnp.sum(jnp.exp(xm - m_new), axis=-1, keepdims=True))
        m_ref[...] = m_new

    rem = c_total % tc  # static: nonzero only when the last class block is ragged
    if rem == 0:
        update(x)                                   # no masking anywhere
    else:
        @pl.when(k < nk - 1)
        def _():
            update(x)                               # interior blocks: unmasked

        @pl.when(k == nk - 1)
        def _():
            lane = jax.lax.broadcasted_iota(jnp.int32, x.shape, 1)
            update(jnp.where(lane < rem, x, -jnp.inf))   # edge block only

    @pl.when(k == nk - 1)
    def _():
        lse_ref[...] = m_ref[...] + jnp.log(l_ref[...])


def _vmem_capacity_bytes():
    try:
        return int(pltpu.get_tpu_info().vmem_capacity_bytes)
    except Exception:
        return 64 * 1024 * 1024  # conservative: v7x per-core VMEM


def _pick_tiles(n, c, itemsize, vmem_capacity):
    """Largest (tn, tc) whose double-buffered logits footprint fits VMEM."""
    budget = max(8 << 20, int(vmem_capacity * 0.7))   # for 2x logits buffers
    per_buf = budget // 2

    rows_per_buf = per_buf // max(1, c * itemsize)
    if rows_per_buf >= min(n, 8):
        # Whole class dim fits in one tile: single pass, no online loop.
        tc = c
        tn = min(n, 512, rows_per_buf)
        if tn < n:
            tn = max(8, (tn // 8) * 8)
    else:
        # Class-blocked streaming: biggest tn that still allows tc >= 2048.
        tn, tc = 8, 128
        for tn_cand in (512, 256, 128, 64, 32, 16, 8):
            tn = min(n, tn_cand)
            if tn < n:
                tn = max(8, (tn // 8) * 8)
            max_tc = per_buf // max(1, tn * itemsize)
            tc = min(c, 8192, (max_tc // 128) * 128)
            if tc >= 2048 or tn_cand == 8:
                break
        tc = max(128, tc)
    return tn, tc


def cross_entropy_loss(logits, targets, *, tn=None, tc=None):
    """logits: (N, C) float (any dtype), targets: (N,) int. Scalar mean loss."""
    n, c = logits.shape
    itemsize = jnp.dtype(logits.dtype).itemsize
    vmem_cap = _vmem_capacity_bytes()

    auto_tn, auto_tc = _pick_tiles(n, c, itemsize, vmem_cap)
    tn = auto_tn if tn is None else min(int(tn), n)
    tc = auto_tc if tc is None else min(int(tc), c)
    # (8, 128) block constraint: partial-axis tiles must be aligned.
    if tn < n:
        assert tn % 8 == 0, "row tile must be a multiple of 8"
    if tc < c:
        assert tc % 128 == 0, "class tile must be a multiple of 128"

    grid = (pl.cdiv(n, tn), pl.cdiv(c, tc))
    tile_bytes = tn * tc * itemsize
    # Exact-ish budget: double-buffered logits + scratch/output/headroom,
    # clamped to this generation's physical VMEM.
    vmem_limit = int(min(vmem_cap, 2 * tile_bytes + (4 << 20)))

    kernel = functools.partial(_ce_lse_kernel, c_total=c, tc=tc)

    lse = pl.pallas_call(
        kernel,
        out_shape=jax.ShapeDtypeStruct((n, 1), jnp.float32),
        grid_spec=pltpu.PrefetchScalarGridSpec(
            num_scalar_prefetch=0,
            grid=grid,
            in_specs=[
                # logits tile, pipelined over both grid axes
                pl.BlockSpec((tn, tc), lambda i, k: (i, k)),
            ],
            # per-row logsumexp; block indexed only by the row axis
            out_specs=pl.BlockSpec((tn, 1), lambda i, k: (i, 0)),
            scratch_shapes=[
                pltpu.VMEM((tn, 1), jnp.float32),   # running max
                pltpu.VMEM((tn, 1), jnp.float32),   # running sum of exp
            ],
        ),
        compiler_params=pltpu.CompilerParams(
            # rows are independent (megacore-shardable); classes are the
            # reduction axis.
            dimension_semantics=("parallel", "arbitrary"),
            vmem_limit_bytes=vmem_limit,
        ),
        cost_estimate=pl.CostEstimate(
            flops=4 * n * c,
            transcendentals=n * c,
            bytes_accessed=n * c * itemsize + n * 4,
        ),
    )(logits)

    # Tiny wrapper-side work: gather the target logits and take the mean.
    picked = jnp.take_along_axis(
        logits, targets.astype(jnp.int32)[:, None], axis=-1).astype(jnp.float32)
    return jnp.mean(lse - picked)


def _reference(logits, targets):
    logp = jax.nn.log_softmax(logits.astype(jnp.float32), axis=-1)
    picked = jnp.take_along_axis(logp, targets.astype(jnp.int32)[:, None], axis=-1)
    return -jnp.mean(picked)


if __name__ == "__main__":
    key = jax.random.PRNGKey(0)
    k1, k2, k3, k4 = jax.random.split(key, 4)

    # Small shapes consistent with the module: batch of 8 logits over 32 classes.
    N, C = 8, 32
    logits = jax.random.normal(k1, (N, C), dtype=jnp.float32)
    targets = jax.random.randint(k2, (N,), 0, C, dtype=jnp.int32)

    loss = jax.block_until_ready(cross_entropy_loss(logits, targets))
    ref = _reference(logits, targets)
    assert jnp.allclose(loss, ref, atol=1e-5, rtol=1e-5), (loss, ref)

    # Exercise class blocking, ragged edge masking and bf16 streaming.
    N2, C2 = 50, 200
    logits2 = jax.random.normal(k3, (N2, C2), dtype=jnp.bfloat16)
    targets2 = jax.random.randint(k4, (N2,), 0, C2, dtype=jnp.int32)
    loss2 = jax.block_until_ready(
        cross_entropy_loss(logits2, targets2, tn=16, tc=128))
    ref2 = _reference(logits2.astype(jnp.float32), targets2)
    assert jnp.allclose(loss2, ref2, atol=2e-2, rtol=2e-2), (loss2, ref2)

    print("KERNEL_OK")
</pallas_src>

<mosaic_0001>
module attributes {stable_mosaic.version = 11 : i64} {
  func.func @_ce_lse_kernel(%arg0: i32, %arg1: i32, %arg2: memref<8x32xf32, #tpu.memory_space<vmem>>, %arg3: memref<8x1xf32, #tpu.memory_space<vmem>>, %arg4: memref<8x1xf32, #tpu.memory_space<vmem>>, %arg5: memref<8x1xf32, #tpu.memory_space<vmem>>) attributes {dimension_semantics = [#tpu.dimension_semantics<parallel>, #tpu.dimension_semantics<arbitrary>], iteration_bounds = array<i64: 1, 1>, scalar_prefetch = 0 : i64, scratch_operands = 2 : i64, tpu.core_type = #tpu.core_type<tc>, window_params = [{transform_indices = @transform_0, window_bounds = array<i64: 8, 32>}, {transform_indices = @transform_1, window_bounds = array<i64: 8, 1>}]} {
    %c0_i32 = arith.constant 0 : i32
    %0 = arith.cmpi eq, %arg1, %c0_i32 : i32
    %1 = arith.extui %0 : i1 to i32
    %c0_i32_0 = arith.constant 0 : i32
    %2 = arith.cmpi ne, %1, %c0_i32_0 : i32
    scf.if %2 {
      %cst_13 = arith.constant 0xFF800000 : f32
      %23 = vector.broadcast %cst_13 : f32 to vector<8x1xf32>
      %c0_14 = arith.constant 0 : index
      %c0_15 = arith.constant 0 : index
      %24 = vector.load %arg4[%c0_14, %c0_15] : memref<8x1xf32, #tpu.memory_space<vmem>>, vector<8x1xf32>
      tpu.vector_store %arg4[%c0_14, %c0_15], %23 {strides = array<i32>} : memref<8x1xf32, #tpu.memory_space<vmem>>, vector<8x1xf32>,
      %cst_16 = arith.constant 0.000000e+00 : f32
      %25 = vector.broadcast %cst_16 : f32 to vector<8x1xf32>
      %c0_17 = arith.constant 0 : index
      %c0_18 = arith.constant 0 : index
      %26 = vector.load %arg5[%c0_17, %c0_18] : memref<8x1xf32, #tpu.memory_space<vmem>>, vector<8x1xf32>
      tpu.vector_store %arg5[%c0_17, %c0_18], %25 {strides = array<i32>} : memref<8x1xf32, #tpu.memory_space<vmem>>, vector<8x1xf32>,
    } else {
    }
    %c0 = arith.constant 0 : index
    %c0_1 = arith.constant 0 : index
    %3 = vector.load %arg2[%c0, %c0_1] : memref<8x32xf32, #tpu.memory_space<vmem>>, vector<8x32xf32>
    %c0_2 = arith.constant 0 : index
    %c0_3 = arith.constant 0 : index
    %4 = vector.load %arg4[%c0_2, %c0_3] : memref<8x1xf32, #tpu.memory_space<vmem>>, vector<8x1xf32>
    %cst = arith.constant dense<0xFF800000> : vector<8xf32>
    %5 = vector.multi_reduction <maximumf>, %3, %cst [1] : vector<8x32xf32> to vector<8xf32>
    %6 = vector.shape_cast %5 : vector<8xf32> to vector<8x1xf32>
    %7 = arith.maximumf %4, %6 : vector<8x1xf32>
    %8 = arith.subf %4, %7 : vector<8x1xf32>
    %9 = math.exp %8 : vector<8x1xf32>
    %c0_4 = arith.constant 0 : index
    %c0_5 = arith.constant 0 : index
    %10 = vector.load %arg5[%c0_4, %c0_5] : memref<8x1xf32, #tpu.memory_space<vmem>>, vector<8x1xf32>
    %11 = arith.mulf %9, %10 : vector<8x1xf32>
    %12 = vector.broadcast %7 : vector<8x1xf32> to vector<8x32xf32>
    %13 = arith.subf %3, %12 : vector<8x32xf32>
    %14 = math.exp %13 : vector<8x32xf32>
    %cst_6 = arith.constant dense<0.000000e+00> : vector<8xf32>
    %15 = vector.multi_reduction <add>, %14, %cst_6 [1] : vector<8x32xf32> to vector<8xf32>
    %16 = vector.shape_cast %15 : vector<8xf32> to vector<8x1xf32>
    %17 = arith.addf %11, %16 : vector<8x1xf32>
    %c0_7 = arith.constant 0 : index
    %c0_8 = arith.constant 0 : index
    %18 = vector.load %arg5[%c0_7, %c0_8] : memref<8x1xf32, #tpu.memory_space<vmem>>, vector<8x1xf32>
    tpu.vector_store %arg5[%c0_7, %c0_8], %17 {strides = array<i32>} : memref<8x1xf32, #tpu.memory_space<vmem>>, vector<8x1xf32>,
    %c0_9 = arith.constant 0 : index
    %c0_10 = arith.constant 0 : index
    %19 = vector.load %arg4[%c0_9, %c0_10] : memref<8x1xf32, #tpu.memory_space<vmem>>, vector<8x1xf32>
    tpu.vector_store %arg4[%c0_9, %c0_10], %7 {strides = array<i32>} : memref<8x1xf32, #tpu.memory_space<vmem>>, vector<8x1xf32>,
    %c0_i32_11 = arith.constant 0 : i32
    %20 = arith.cmpi eq, %arg1, %c0_i32_11 : i32
    %21 = arith.extui %20 : i1 to i32
    %c0_i32_12 = arith.constant 0 : i32
    %22 = arith.cmpi ne, %21, %c0_i32_12 : i32
    scf.if %22 {
      %c0_13 = arith.constant 0 : index
      %c0_14 = arith.constant 0 : index
      %23 = vector.load %arg4[%c0_13, %c0_14] : memref<8x1xf32, #tpu.memory_space<vmem>>, vector<8x1xf32>
      %c0_15 = arith.constant 0 : index
      %c0_16 = arith.constant 0 : index
      %24 = vector.load %arg5[%c0_15, %c0_16] : memref<8x1xf32, #tpu.memory_space<vmem>>, vector<8x1xf32>
      %25 = math.log %24 : vector<8x1xf32>
      %26 = arith.addf %23, %25 : vector<8x1xf32>
      %c0_17 = arith.constant 0 : index
      %c0_18 = arith.constant 0 : index
      %27 = vector.load %arg3[%c0_17, %c0_18] : memref<8x1xf32, #tpu.memory_space<vmem>>, vector<8x1xf32>
      tpu.vector_store %arg3[%c0_17, %c0_18], %26 {strides = array<i32>} : memref<8x1xf32, #tpu.memory_space<vmem>>, vector<8x1xf32>,
    } else {
    }
    return
  }
  func.func @transform_0(%arg0: i32, %arg1: i32) -> (i32, i32) {
    %c0_i32 = arith.constant 0 : i32
    return %arg0, %arg1 : i32, i32
  }
  func.func @transform_1(%arg0: i32, %arg1: i32) -> (i32, i32) {
    %c0_i32 = arith.constant 0 : i32
    %c0_i32_0 = arith.constant 0 : i32
    return %arg0, %c0_i32 : i32, i32
  }
}

</mosaic_0001>

<bundles_post_ra>
// kernel: tpu_custom_call.1
= control target key start
LH: loop header
LB: loop body
LE: loop exit
PB: predicated region body
PF: predicated region fallthrough
CT: control target
= control target key end

     0   :  { %6 = vsyncpa [#allocation5], 0  ;;  %s101_s6 = smov [#allocation4]   ;;  %s128_s0 = inlined_call_operand.hbm [shape: f32[8,32], index: 0, kind: input, shape index: {}]   ;;  %s129_s1 = inlined_call_operand.vmem [shape: f32[8,1], index: 1, kind: output, shape index: {}]  }
   0x1   :  { %s13_s7 = sshll.u32 %s101_s6, 4  ;;  %s14_s7 = int_to_ptr.vmem [resolvable:$true] %s13_s7 }
   0x2   :  { %s87_s8 = scalar_lea.vmem %s14_s7, 128  ;;  %p92_p1 = scmp.lt.s32.totalorder %s14_s7, %s14_s7 }
   0x3   :  { %p88_p0 = scmp.ne.s32.totalorder %s14_s7, %s87_s8  ;;  %p93_p2 = scmp.lt.s32.totalorder %s87_s8, %s87_s8 }
   0x5   :  { %p94_p3 = por %p93_p2, %p92_p1 }
   0x7   :  { %p95_p4 = pnand %p94_p3, %p88_p0 }
   0x9   :  { %98 = shalt.err (!%p95_p4)
}
   0xa   :  { %16 = dma.hbm_to_vmem [thread:$0]  %s128_s0, 128, %s14_s7, [#allocation5]  }
   0xb   :  { %99 = dma.done.wait [#allocation5], 128  }
   0xc   :  { %100 = vsyncadd [#allocation5], 4294967168  ;;  %vm24_vm0 = vcmask 7168   ;;  %v102_v0 = vmov -inf   ;;  %vm29_vm1 = vcmask 261120   ;;  %v27_v1 = vld [vmem:[#allocation4] sm:$0xff] }
   0xd   :  { %25 = vst.msk [vmem:[#allocation2] sm:$0xff] %vm24_vm0, %v102_v0  ;;  %v30_v2 = vsel %vm29_vm1, %v27_v1, -inf  ;;  %v103_v3 = vmov 0   ;;  %v104_v4 = vmov 0.0  }
   0xe   :  { %31 = vmax.xlane.f32.xlu0 %v30_v2  ;;  %26 = vst.msk [vmem:[#allocation3] sm:$0xff] %vm24_vm0, %v104_v4 }
   0xf   :  { %72 = vset.pattern.permute.xlu0 %v103_v3 }
  0x14   :  { %v28_v5 = vld [vmem:[#allocation2] sm:$0xff] }
  0x15   :  { %v37_v16 = vld [vmem:[#allocation3] sm:$0xff] }
  0x97   :  { %v32_v6 = vpop.xlane.xlu0 %31 }
  0x98   :  { %v33_v7 = vmax.f32 %v28_v5, %v32_v6 }
  0x9a   :  { %v34_v8 = vsub.f32 %v28_v5, %v33_v7  ;;  %53 = vst.msk [vmem:[#allocation2] sm:$0xff] %vm24_vm0, %v33_v7  ;;  %41 = vperm.xlu0 %72, %v33_v7  }
  0x9c   :  { %v35_v14 = vmul.f32 1.442695, %v34_v8 }
  0xa1   :  { %v57_v23 = vld [vmem:[#allocation2] sm:$0xff] }
 0x115   :  { %v42_v9 = vpop.permute.xlu0 %41 }
 0x116   :  { %v44_v10 = vsub.f32 %v27_v1, %v42_v9 }
 0x118   :  { %v45_v11 = vmul.f32 1.442695, %v44_v10 }
 0x11a   :  { %73 = vpow2.f32 %v45_v11 }
 0x11b   :  { %75 = vpow2.f32 %v35_v14 }
 0x127   :  { %v74_v12 = vpop.eup %73 }
 0x128   :  { %v47_v13 = vsel %vm29_vm1, %v74_v12, 0.0  ;;  %v76_v15 = vpop.eup %75 }
 0x129   :  { %48 = vadd.xlane.f32.xlu1 %v47_v13  ;;  %v38_v17 = vmul.f32 %v76_v15, %v37_v16 }
 0x1b2   :  { %v49_v18 = vpop.xlane.xlu1 %48 }
 0x1b3   :  { %v50_v19 = vadd.f32 %v49_v18, %v38_v17 }
 0x1b5   :  { %52 = vst.msk [vmem:[#allocation3] sm:$0xff] %vm24_vm0, %v50_v19 }
 0x1bc   :  { %v58_v20 = vld [vmem:[#allocation3] sm:$0xff] }
 0x1bd   :  { %77 = vlog2.f32 %v58_v20 }
 0x1ca   :  { %v78_v21 = vpop.eup %77 }
 0x1cb   :  { %v60_v22 = vmul.f32 0.6931472, %v78_v21 }
 0x1cd   :  { %v61_v24 = vadd.f32 %v60_v22, %v57_v23 }
 0x1cf   :  { %62 = vst.msk [vmem:[%s129_s1] sm:$0xff] %vm24_vm0, %v61_v24 }
 0x1d0   :  { %67 = vsyncpa [#allocation5], 1 }

</bundles_post_ra>
